<compile_context>
chip_gen: v7x
topology: tpu7x:2x2x1
jax: 0.10.0
libtpu: 0.0.40
codegen_flags: <defaults>
</compile_context>

<pallas_src>
import jax
import jax.numpy as jnp
from jax.experimental import pallas as pl
from jax.experimental.pallas import tpu as pltpu


# ---------------------------------------------------------------------------
# helpers
# ---------------------------------------------------------------------------

def _physical_vmem_bytes():
    """Per-core VMEM capacity; conservative 64 MiB (v7x) if the query fails."""
    try:
        info = pltpu.get_tpu_info()
        for attr in ("vmem_capacity_bytes", "vmem_bytes", "vmem_size_bytes"):
            v = getattr(info, attr, None)
            if v:
                return int(v)
    except Exception:
        pass
    return 64 * 1024 * 1024


def _pick_bt(B, per_batch_bytes, target_bytes, min_block_bytes=1 << 20):
    """Largest divisor of B whose block fits `target_bytes`; then prefer >=2
    (ideally an even number of) grid steps while blocks stay >= 1 MiB."""
    divs = [d for d in range(1, B + 1) if B % d == 0]
    fitting = [d for d in divs if d * per_batch_bytes <= target_bytes]
    bt = max(fitting) if fitting else 1
    if B // bt < 2:
        cands = [d for d in divs
                 if d < bt and d * per_batch_bytes >= min_block_bytes]
        even = [d for d in cands if (B // d) % 2 == 0]
        pool = even or cands
        if pool:
            bt = max(pool)
    return bt


# ---------------------------------------------------------------------------
# single-pass fused kernel (primary path)
# ---------------------------------------------------------------------------

def _make_fused_kernel(out_dtype, low_precision_mul):
    def kernel(x_ref, w1t_ref, w2t_ref, o_ref):
        x = x_ref[...]                                # (Bt, C, HW) full HW
        xf = x.astype(jnp.float32)
        hw = x.shape[-1]
        inv_hw = 1.0 / float(hw)

        # Global pooling over the spatial (lane) axis.  Block == full HW, so
        # no padding exists in the logical view: sums/maxes are exact.
        avg = jnp.sum(xf, axis=2) * inv_hw            # (Bt, C)
        mx = jnp.max(xf, axis=2)                      # (Bt, C)

        # Shared MLP.  fc2 is linear & bias-free, so
        # fc2(relu(fc1(avg))) + fc2(relu(fc1(max))) fuses into one fc2 matmul.
        h = (jnp.maximum(jnp.dot(avg, w1t_ref[...],
                                 preferred_element_type=jnp.float32), 0.0)
             + jnp.maximum(jnp.dot(mx, w1t_ref[...],
                                   preferred_element_type=jnp.float32), 0.0))
        gate = jax.nn.sigmoid(jnp.dot(h, w2t_ref[...],
                                      preferred_element_type=jnp.float32))

        if low_precision_mul:
            # bf16 streaming: one downcast of the tiny gate, multiply in x's dtype.
            o_ref[...] = (x * gate.astype(x.dtype)[:, :, None]).astype(out_dtype)
        else:
            o_ref[...] = (xf * gate[:, :, None]).astype(out_dtype)

    return kernel


# ---------------------------------------------------------------------------
# two-pass HW-tiled fallback (for slabs too large to double-buffer in VMEM)
# ---------------------------------------------------------------------------

def _make_pool_kernel(tile_hw, HW, n_t):
    inv_hw = 1.0 / float(HW)
    partial_tail = (n_t * tile_hw) != HW

    def kernel(x_ref, avg_ref, max_ref):
        t = pl.program_id(1)

        @pl.when(t == 0)
        def _():
            avg_ref[...] = jnp.zeros_like(avg_ref)
            max_ref[...] = jnp.full_like(max_ref, -jnp.inf)

        x = x_ref[...].astype(jnp.float32)            # (1, C, tile_hw)
        if partial_tail:
            # Only the last tile reads past HW; mask those lanes.
            lane = jax.lax.broadcasted_iota(jnp.int32, (1, 1, tile_hw), 2)
            valid = (t * tile_hw + lane) < HW
            x_sum = jnp.where(valid, x, 0.0)
            x_max = jnp.where(valid, x, -jnp.inf)
        else:
            x_sum, x_max = x, x

        avg_ref[...] += jnp.sum(x_sum, axis=2, keepdims=True) * inv_hw
        max_ref[...] = jnp.maximum(max_ref[...],
                                   jnp.max(x_max, axis=2, keepdims=True))

    return kernel


def _make_apply_kernel(out_dtype):
    def kernel(x_ref, gate_ref, o_ref):
        o_ref[...] = (x_ref[...].astype(jnp.float32)
                      * gate_ref[...]).astype(out_dtype)
    return kernel


def _two_pass(x_flat, w1t, w2t, out_dtype, vmem_cap, tile_hw=None):
    B, C, HW = x_flat.shape
    in_itemsize = jnp.dtype(x_flat.dtype).itemsize
    out_itemsize = jnp.dtype(out_dtype).itemsize

    if tile_hw is None:
        # ~2 MiB input tiles, lane-multiple widths.
        lanes = (2 * 1024 * 1024) // max(1, C * in_itemsize)
        tile_hw = max(128, (lanes // 128) * 128)
    tile_hw = int(min(tile_hw, HW))
    n_t = -(-HW // tile_hw)
    # TODO(synk): tile C as well if C*128 tiles ever exceed VMEM (not expected
    # for CBAM-scale channel counts).

    # ---- pass 1: pooled avg / max per (b, c) ----
    pool_kernel = _make_pool_kernel(tile_hw, HW, n_t)
    avg3, max3 = pl.pallas_call(
        pool_kernel,
        out_shape=(jax.ShapeDtypeStruct((B, C, 1), jnp.float32),
                   jax.ShapeDtypeStruct((B, C, 1), jnp.float32)),
        grid_spec=pltpu.PrefetchScalarGridSpec(
            num_scalar_prefetch=0,
            grid=(B, n_t),
            in_specs=[pl.BlockSpec((1, C, tile_hw), lambda b, t: (b, 0, t))],
            out_specs=[pl.BlockSpec((1, C, 1), lambda b, t: (b, 0, 0)),
                       pl.BlockSpec((1, C, 1), lambda b, t: (b, 0, 0))],
        ),
        compiler_params=pltpu.CompilerParams(
            dimension_semantics=("parallel", "arbitrary"),
            vmem_limit_bytes=int(min(
                max(4 * C * tile_hw * in_itemsize + (4 << 20), 16 << 20),
                vmem_cap)),
        ),
    )(x_flat)

    # ---- tiny shared MLP on (B, C) in plain JAX (negligible) ----
    avg = avg3[:, :, 0]
    mx = max3[:, :, 0]
    h = jnp.maximum(avg @ w1t, 0.0) + jnp.maximum(mx @ w1t, 0.0)
    gate = jax.nn.sigmoid(h @ w2t).astype(jnp.float32)[:, :, None]  # (B, C, 1)

    # ---- pass 2: apply the gate ----
    apply_kernel = _make_apply_kernel(out_dtype)
    out_flat = pl.pallas_call(
        apply_kernel,
        out_shape=jax.ShapeDtypeStruct((B, C, HW), out_dtype),
        grid_spec=pltpu.PrefetchScalarGridSpec(
            num_scalar_prefetch=0,
            grid=(B, n_t),
            in_specs=[pl.BlockSpec((1, C, tile_hw), lambda b, t: (b, 0, t)),
                      pl.BlockSpec((1, C, 1), lambda b, t: (b, 0, 0))],
            out_specs=pl.BlockSpec((1, C, tile_hw), lambda b, t: (b, 0, t)),
        ),
        compiler_params=pltpu.CompilerParams(
            dimension_semantics=("parallel", "parallel"),
            vmem_limit_bytes=int(min(
                max(2 * C * tile_hw * (in_itemsize + out_itemsize) + (4 << 20),
                    16 << 20),
                vmem_cap)),
        ),
    )(x_flat, gate)
    return out_flat


# ---------------------------------------------------------------------------
# public wrapper
# ---------------------------------------------------------------------------

def channel_attention_pallas(x_nchw, w1, w2, *,
                             stream_dtype=None,
                             out_dtype=None,
                             target_block_bytes=4 * 1024 * 1024,
                             force_two_pass=False,
                             fallback_tile_hw=None):
    """CBAM channel attention.  x_nchw: (B,C,H,W); w1: (C//16,C); w2: (C,C//16)."""
    B, C, H, W = x_nchw.shape
    HW = H * W
    out_dtype = jnp.dtype(x_nchw.dtype if out_dtype is None else out_dtype)

    x_flat = x_nchw.reshape(B, C, HW)                 # free reshape, no pad/copy
    if stream_dtype is not None:
        x_flat = x_flat.astype(stream_dtype)
    in_dtype = jnp.dtype(x_flat.dtype)
    in_itemsize = in_dtype.itemsize
    out_itemsize = out_dtype.itemsize

    # Pre-transposed weights: (Bt,C)@(C,Cr), (Bt,Cr)@(Cr,C).
    w1t = jnp.asarray(w1, jnp.float32).T              # (C, Cr)
    w2t = jnp.asarray(w2, jnp.float32).T              # (Cr, C)
    weight_bytes = 4 * (w1t.size + w2t.size)

    vmem_cap = max(_physical_vmem_bytes() - (8 << 20), 24 << 20)

    per_batch_in = C * HW * in_itemsize
    per_batch_out = C * HW * out_itemsize
    Bt = _pick_bt(B, per_batch_in + per_batch_out, target_block_bytes)

    def fused_need(bt):
        # 2x double-buffered input + 2x output + weights (x2) + slack.
        return (2 * bt * per_batch_in + 2 * bt * per_batch_out
                + 2 * weight_bytes + (2 << 20))

    while Bt > 1 and fused_need(Bt) > vmem_cap:
        Bt = max(d for d in range(1, Bt) if B % d == 0)

    if force_two_pass or fused_need(Bt) > vmem_cap:
        out_flat = _two_pass(x_flat, w1t, w2t, out_dtype, vmem_cap,
                             tile_hw=fallback_tile_hw)
    else:
        kernel = _make_fused_kernel(
            out_dtype, low_precision_mul=(in_dtype != jnp.dtype(jnp.float32)))
        vmem_limit = int(min(max(fused_need(Bt), 32 << 20), vmem_cap))
        out_flat = pl.pallas_call(
            kernel,
            out_shape=jax.ShapeDtypeStruct((B, C, HW), out_dtype),
            grid_spec=pltpu.PrefetchScalarGridSpec(
                num_scalar_prefetch=0,
                grid=(B // Bt,),
                in_specs=[
                    pl.BlockSpec((Bt, C, HW), lambda i: (i, 0, 0)),
                    pl.BlockSpec(w1t.shape, lambda i: (0, 0)),
                    pl.BlockSpec(w2t.shape, lambda i: (0, 0)),
                ],
                out_specs=pl.BlockSpec((Bt, C, HW), lambda i: (i, 0, 0)),
            ),
            compiler_params=pltpu.CompilerParams(
                dimension_semantics=("parallel",),
                vmem_limit_bytes=vmem_limit,
            ),
        )(x_flat, w1t, w2t)

    return out_flat.reshape(B, C, H, W)


# ---------------------------------------------------------------------------
# reference + tests
# ---------------------------------------------------------------------------

def channel_attention_ref(x, w1, w2):
    """Pure-JAX reference matching the PyTorch forward."""
    avg = jnp.mean(x, axis=(2, 3), keepdims=True)
    mx = jnp.max(x, axis=(2, 3), keepdims=True)

    def mlp(p):
        v = p[:, :, 0, 0]
        h = jnp.maximum(v @ w1.T, 0.0)
        o = h @ w2.T
        return o[:, :, None, None]

    gate = jax.nn.sigmoid(mlp(avg) + mlp(mx))
    return x * gate


if __name__ == "__main__":
    key = jax.random.PRNGKey(0)
    C = 32                       # module hardcodes //16, so C >= 16
    Cr = C // 16
    kx1, k1, k2, kx2, kx3 = jax.random.split(key, 5)

    w1 = jax.random.normal(k1, (Cr, C), dtype=jnp.float32) * 0.1   # fc1
    w2 = jax.random.normal(k2, (C, Cr), dtype=jnp.float32) * 0.1   # fc2

    # case 1: lane-aligned spatial (HW = 256)
    x1 = jax.random.normal(kx1, (2, C, 16, 16), dtype=jnp.float32)
    o1 = jax.block_until_ready(channel_attention_pallas(x1, w1, w2))
    r1 = channel_attention_ref(x1, w1, w2)
    assert o1.shape == x1.shape
    assert jnp.allclose(o1, r1, atol=1e-5, rtol=1e-5)

    # case 2: non-128-multiple spatial (HW = 49): full-HW block, no pad/slice
    x2 = jax.random.normal(kx2, (3, C, 7, 7), dtype=jnp.float32)
    o2 = jax.block_until_ready(channel_attention_pallas(x2, w1, w2))
    r2 = channel_attention_ref(x2, w1, w2)
    assert o2.shape == x2.shape
    assert jnp.allclose(o2, r2, atol=1e-5, rtol=1e-5)

    # case 3: forced two-pass fallback (HW-tiled pooling + gate-apply),
    # exercising the accumulation + tail-mask path (HW = 400, tile = 128).
    x3 = jax.random.normal(kx3, (2, C, 20, 20), dtype=jnp.float32)
    o3 = jax.block_until_ready(channel_attention_pallas(
        x3, w1, w2, force_two_pass=True, fallback_tile_hw=128))
    r3 = channel_attention_ref(x3, w1, w2)
    assert o3.shape == x3.shape
    assert jnp.allclose(o3, r3, atol=1e-5, rtol=1e-5)

    print("KERNEL_OK")
</pallas_src>

<mosaic_0001>
module attributes {stable_mosaic.version = 11 : i64} {
  func.func @kernel(%arg0: i32, %arg1: memref<2x32x256xf32, #tpu.memory_space<vmem>>, %arg2: memref<32x2xf32, #tpu.memory_space<vmem>>, %arg3: memref<2x32xf32, #tpu.memory_space<vmem>>, %arg4: memref<2x32x256xf32, #tpu.memory_space<vmem>>) attributes {dimension_semantics = [#tpu.dimension_semantics<parallel>], iteration_bounds = array<i64: 1>, scalar_prefetch = 0 : i64, scratch_operands = 0 : i64, tpu.core_type = #tpu.core_type<tc>, window_params = [{transform_indices = @transform_0, window_bounds = array<i64: 2, 32, 256>}, {pipeline_mode = #tpu.pipeline_mode<synchronous>, transform_indices = @transform_1, window_bounds = array<i64: 32, 2>}, {pipeline_mode = #tpu.pipeline_mode<synchronous>, transform_indices = @transform_2, window_bounds = array<i64: 2, 32>}, {transform_indices = @transform_3, window_bounds = array<i64: 2, 32, 256>}]} {
    %c0 = arith.constant 0 : index
    %c0_0 = arith.constant 0 : index
    %c0_1 = arith.constant 0 : index
    %0 = vector.load %arg1[%c0, %c0_0, %c0_1] : memref<2x32x256xf32, #tpu.memory_space<vmem>>, vector<2x32x256xf32>
    %cst = arith.constant dense<0.000000e+00> : vector<2x32xf32>
    %1 = vector.multi_reduction <add>, %0, %cst [2] : vector<2x32x256xf32> to vector<2x32xf32>
    %cst_2 = arith.constant 3.906250e-03 : f32
    %2 = vector.broadcast %cst_2 : f32 to vector<2x32xf32>
    %3 = arith.mulf %1, %2 : vector<2x32xf32>
    %cst_3 = arith.constant dense<0xFF800000> : vector<2x32xf32>
    %4 = vector.multi_reduction <maximumf>, %0, %cst_3 [2] : vector<2x32x256xf32> to vector<2x32xf32>
    %c0_4 = arith.constant 0 : index
    %c0_5 = arith.constant 0 : index
    %5 = vector.load %arg2[%c0_4, %c0_5] : memref<32x2xf32, #tpu.memory_space<vmem>>, vector<32x2xf32>
    %cst_6 = arith.constant dense<0.000000e+00> : vector<2x2xf32>
    %6 = tpu.matmul %3, %5, %cst_6 {dimension_numbers = #tpu.dot_dimension_numbers<[1], [0], [0], [1], [0, 0, 1, 1], [], []>} : vector<2x32xf32>, vector<32x2xf32>, vector<2x2xf32> -> vector<2x2xf32>
    %cst_7 = arith.constant 0.000000e+00 : f32
    %7 = vector.broadcast %cst_7 : f32 to vector<2x2xf32>
    %8 = arith.maximumf %6, %7 : vector<2x2xf32>
    %c0_8 = arith.constant 0 : index
    %c0_9 = arith.constant 0 : index
    %9 = vector.load %arg2[%c0_8, %c0_9] : memref<32x2xf32, #tpu.memory_space<vmem>>, vector<32x2xf32>
    %cst_10 = arith.constant dense<0.000000e+00> : vector<2x2xf32>
    %10 = tpu.matmul %4, %9, %cst_10 {dimension_numbers = #tpu.dot_dimension_numbers<[1], [0], [0], [1], [0, 0, 1, 1], [], []>} : vector<2x32xf32>, vector<32x2xf32>, vector<2x2xf32> -> vector<2x2xf32>
    %cst_11 = arith.constant 0.000000e+00 : f32
    %11 = vector.broadcast %cst_11 : f32 to vector<2x2xf32>
    %12 = arith.maximumf %10, %11 : vector<2x2xf32>
    %13 = arith.addf %8, %12 : vector<2x2xf32>
    %c0_12 = arith.constant 0 : index
    %c0_13 = arith.constant 0 : index
    %14 = vector.load %arg3[%c0_12, %c0_13] : memref<2x32xf32, #tpu.memory_space<vmem>>, vector<2x32xf32>
    %cst_14 = arith.constant dense<0.000000e+00> : vector<2x32xf32>
    %15 = tpu.matmul %13, %14, %cst_14 {dimension_numbers = #tpu.dot_dimension_numbers<[1], [0], [0], [1], [0, 0, 1, 1], [], []>} : vector<2x2xf32>, vector<2x32xf32>, vector<2x32xf32> -> vector<2x32xf32>
    %16 = arith.negf %15 : vector<2x32xf32>
    %17 = math.exp %16 : vector<2x32xf32>
    %cst_15 = arith.constant 1.000000e+00 : f32
    %18 = vector.broadcast %cst_15 : f32 to vector<2x32xf32>
    %19 = arith.addf %18, %17 : vector<2x32xf32>
    %20 = arith.divf %18, %19 : vector<2x32xf32>
    %21 = vector.shape_cast %20 : vector<2x32xf32> to vector<2x32x1xf32>
    %22 = vector.broadcast %21 : vector<2x32x1xf32> to vector<2x32x256xf32>
    %23 = arith.mulf %0, %22 : vector<2x32x256xf32>
    %c0_16 = arith.constant 0 : index
    %c0_17 = arith.constant 0 : index
    %c0_18 = arith.constant 0 : index
    %24 = vector.load %arg4[%c0_16, %c0_17, %c0_18] : memref<2x32x256xf32, #tpu.memory_space<vmem>>, vector<2x32x256xf32>
    tpu.vector_store %arg4[%c0_16, %c0_17, %c0_18], %23 {strides = array<i32>} : memref<2x32x256xf32, #tpu.memory_space<vmem>>, vector<2x32x256xf32>,
    return
  }
  func.func @transform_0(%arg0: i32) -> (i32, i32, i32) {
    %c0_i32 = arith.constant 0 : i32
    %c0_i32_0 = arith.constant 0 : i32
    %c0_i32_1 = arith.constant 0 : i32
    return %arg0, %c0_i32, %c0_i32_0 : i32, i32, i32
  }
  func.func @transform_1(%arg0: i32) -> (i32, i32) {
    %c0_i32 = arith.constant 0 : i32
    %c0_i32_0 = arith.constant 0 : i32
    %c0_i32_1 = arith.constant 0 : i32
    return %c0_i32, %c0_i32_0 : i32, i32
  }
  func.func @transform_2(%arg0: i32) -> (i32, i32) {
    %c0_i32 = arith.constant 0 : i32
    %c0_i32_0 = arith.constant 0 : i32
    %c0_i32_1 = arith.constant 0 : i32
    return %c0_i32, %c0_i32_0 : i32, i32
  }
  func.func @transform_3(%arg0: i32) -> (i32, i32, i32) {
    %c0_i32 = arith.constant 0 : i32
    %c0_i32_0 = arith.constant 0 : i32
    %c0_i32_1 = arith.constant 0 : i32
    return %arg0, %c0_i32, %c0_i32_0 : i32, i32, i32
  }
}

</mosaic_0001>

<bundles_post_ra>
// kernel: tpu_custom_call.1
= control target key start
LH: loop header
LB: loop body
LE: loop exit
PB: predicated region body
PF: predicated region fallthrough
CT: control target
= control target key end

     0   :  { %8 = vsyncpa [#allocation3], 0  ;;  %s822_s0 = inlined_call_operand.hbm [shape: f32[2,32,256], index: 0, kind: input, shape index: {}]   ;;  %s823_s1 = inlined_call_operand.vmem [shape: f32[32,2], index: 1, kind: input, shape index: {}]   ;;  %s824_s2 = inlined_call_operand.vmem [shape: f32[2,32], index: 2, kind: input, shape index: {}]   ;;  %s825_s3 = inlined_call_operand.hbm [shape: f32[2,32,256], index: 3, kind: output, shape index: {}]  }
   0x1   :  { %9 = vsyncpa [#allocation4], 0  ;;  %s643_s12 = smov [#allocation2]   ;;  %s595_s16 = scalar_lea.hbm %s822_s0, 2048 }
   0x2   :  { %s15_s13 = sshll.u32 %s643_s12, 4  ;;  %p596_p0 = scmp.ne.s32.totalorder %s822_s0, %s595_s16  ;;  %s16_s13 = int_to_ptr.vmem [resolvable:$true] %s15_s13 }
   0x3   :  { %p599_p1 = scmp.lt.u32.totalorder %s595_s16, %s822_s0 }
   0x5   :  { %p601_p2 = pnand %p599_p1, %p596_p0 }
   0x7   :  { %604 = shalt.err (!%p601_p2)
}
   0x8   :  { %s605_s21 = scalar_lea.vmem %s16_s13, 2048  ;;  %p610_p4 = scmp.lt.s32.totalorder %s16_s13, %s16_s13 }
   0x9   :  { %p606_p3 = scmp.ne.s32.totalorder %s16_s13, %s605_s21  ;;  %p611_p5 = scmp.lt.s32.totalorder %s605_s21, %s605_s21 }
   0xb   :  { %p612_p6 = por %p611_p5, %p610_p4 }
   0xd   :  { %p613_p7 = pnand %p612_p6, %p606_p3 }
   0xf   :  { %616 = shalt.err (!%p613_p7)
}
  0x10   :  { %s644_s22 = smov 256   ;;  %s645_s23 = smov 16  }
  0x11   :  { %21 = dma.hbm_to_vmem [thread:$0]  %s822_s0, 2048, %s16_s13, [#allocation3], %s644_s22, %s644_s22, %s645_s23  }
  0x12   :  { %639 = dma.done.wait [#allocation3], 2048  }
  0x13   :  { %640 = vsyncadd [#allocation3], 4294965248  ;;  %v685_v0 = vld [vmem:[#allocation2 + $0x40] sm:$0xff]  ;;  %v687_v1 = vld [vmem:[#allocation2 + $0x48] sm:$0xff]  ;;  %v646_v35 = vmov 0.0|0.0   ;;  %vm647_vm0 = vmmov 0   ;;  %v113_v40 = vlaneseq }
  0x14   :  { %v689_v2 = vld [vmem:[#allocation2] sm:$0xff]  ;;  %v57_v3 = vadd.f32 %v687_v1, %v685_v0  ;;  %v693_v4 = vld [vmem:[#allocation2 + $0x8] sm:$0xff]  ;;  %v695_v5 = vld [vmem:[#allocation2 + $0x50] sm:$0xff]  ;;  %v89_v27 = vmax.f32 %v685_v0, %v687_v1  ;;  %572 = vmatprep.subr.bf16.mxu0 %v646_v35  ;;  %578 = vmatprep.subr.bf16.mxu1 %v646_v35  ;;  %v648_v39 = vmov 0.0   ;;  %vm124_vm1 = vcmask 130112  }
  0x15   :  { %v697_v6 = vld [vmem:[#allocation2 + $0x58] sm:$0xff]  ;;  %v45_v7 = vadd.f32 %v693_v4, %v689_v2  ;;  %v701_v8 = vld [vmem:[#allocation2 + $0x10] sm:$0xff]  ;;  %v709_v12 = vld [vmem:[#allocation2 + $0x60] sm:$0xff]  ;;  %v77_v25 = vmax.f32 %v689_v2, %v693_v4  ;;  %553 = vmatprep.mubr.msk.f32.mxu0 %vm647_vm0, %v648_v39  ;;  %564 = vmatprep.mubr.msk.f32.mxu1 %vm647_vm0, %v648_v39  ;;  %v114_v42 = vand.u32 127, %v113_v40  ;;  %v763_v47 = vshrl.u32 %v113_v40, 7 }
  0x16   :  { %v703_v9 = vld [vmem:[#allocation2 + $0x18] sm:$0xff]  ;;  %58 = vadd.xlane.f32.xlu1 %v57_v3  ;;  %v60_v10 = vadd.f32 %v697_v6, %v695_v5  ;;  %v711_v13 = vld [vmem:[#allocation2 + $0x68] sm:$0xff]  ;;  %v713_v14 = vld [vmem:[#allocation2 + $0x20] sm:$0xff]  ;;  %v92_v26 = vmax.f32 %v695_v5, %v697_v6  ;;  %vm131_vm2 = vcmask 195712   ;;  %vm138_vm3 = vcmask 261312  }
  0x17   :  { %46 = vadd.xlane.f32.xlu0 %v45_v7  ;;  %v48_v11 = vadd.f32 %v703_v9, %v701_v8  ;;  %v715_v15 = vld [vmem:[#allocation2 + $0x28] sm:$0xff]  ;;  %v63_v16 = vadd.f32 %v711_v13, %v709_v12  ;;  %v721_v18 = vld [vmem:[#allocation2 + $0x70] sm:$0xff]  ;;  %v723_v19 = vld [vmem:[#allocation2 + $0x78] sm:$0xff]  ;;  %v80_v24 = vmax.f32 %v701_v8, %v703_v9  ;;  %v95_v28 = vmax.f32 %v709_v12, %v711_v13 }
  0x18   :  { %v51_v17 = vadd.f32 %v715_v15, %v713_v14  ;;  %v725_v20 = vld [vmem:[#allocation2 + $0x30] sm:$0xff]  ;;  %v727_v21 = vld [vmem:[#allocation2 + $0x38] sm:$0xff]  ;;  %v66_v22 = vadd.f32 %v723_v19, %v721_v18  ;;  %v83_v29 = vmax.f32 %v713_v14, %v715_v15  ;;  %v101_v30 = vld [vmem:[%s823_s1] sm:$0xff]  ;;  %v98_v32 = vmax.f32 %v721_v18, %v723_v19 }
  0x19   :  { %v54_v23 = vadd.f32 %v727_v21, %v725_v20  ;;  %v102_v31 = vld [vmem:[%s823_s1 + $0x8] sm:$0xff]  ;;  %v86_v34 = vmax.f32 %v725_v20, %v727_v21  ;;  %v103_v36 = vld [vmem:[%s823_s1 + $0x10] sm:$0xff]  ;;  %v104_v37 = vld [vmem:[%s823_s1 + $0x18] sm:$0xff]  ;;  %v119_v44 = vadd.s32 4294967288, %v114_v42  ;;  %v126_v46 = vadd.s32 4294967280, %v114_v42 }
  0x1a   :  { %61 = vadd.xlane.f32.xlu1 %v60_v10  ;;  %v573_v33 = vpack.c.bf16 %v102_v31, %v101_v30  ;;  %v576_v38 = vpack.c.bf16 %v104_v37, %v103_v36  ;;  %v133_v51 = vadd.s32 4294967272, %v114_v42  ;;  %v117_v55 = vsub.s32 %v114_v42, %v763_v47 }
  0x1b   :  { %49 = vadd.xlane.f32.xlu0 %v48_v11  ;;  %v122_v49 = vsub.s32 %v119_v44, %v763_v47  ;;  %v129_v53 = vsub.s32 %v126_v46, %v763_v47  ;;  %vm159_vm4 = vcmask 1041409   ;;  %vm161_vm5 = vcmask 261120  }
  0x1c   :  { %574 = vmatpush3.bf16.msra.mxu0 %v573_v33  ;;  %580 = vmatpush3.bf16.msra.mxu1 %v573_v33  ;;  %v136_v62 = vsub.s32 %v133_v51, %v763_v47  ;;  %vm361_vm6 = vcmask 1041408   ;;  %vm357_vm7 = vcmask 15360  }
  0x1d   :  { %575 = vmatprep.subr.bf16.mxu0 %v646_v35  ;;  %581 = vmatprep.subr.bf16.mxu1 %v646_v35 }
  0x1e   :  { %64 = vadd.xlane.f32.xlu1 %v63_v16 }
  0x1f   :  { %52 = vadd.xlane.f32.xlu0 %v51_v17 }
  0x20   :  { %577 = vmatpush3.bf16.msra.mxu0 %v576_v38  ;;  %583 = vmatpush3.bf16.msra.mxu1 %v576_v38 }
  0x21   :  { %567 = vmatprep.subr.mxu0 %v648_v39 }
  0x22   :  { %67 = vadd.xlane.f32.xlu1 %v66_v22 }
  0x23   :  { %55 = vadd.xlane.f32.xlu0 %v54_v23 }
  0x26   :  { %81 = vmax.xlane.f32.xlu1 %v80_v24 }
  0x27   :  { %78 = vmax.xlane.f32.xlu0 %v77_v25 }
  0x2a   :  { %93 = vmax.xlane.f32.xlu1 %v92_v26 }
  0x2b   :  { %90 = vmax.xlane.f32.xlu0 %v89_v27 }
  0x2e   :  { %96 = vmax.xlane.f32.xlu1 %v95_v28 }
  0x2f   :  { %84 = vmax.xlane.f32.xlu0 %v83_v29 }
  0x32   :  { %99 = vmax.xlane.f32.xlu1 %v98_v32 }
  0x33   :  { %87 = vmax.xlane.f32.xlu0 %v86_v34 }
  0xa3   :  { %v59_v41 = vpop.xlane.xlu1 %58 }
  0xa4   :  { %v47_v43 = vpop.xlane.xlu0 %46  ;;  %v73_v56 = vmul.f32 0.00390625, %v59_v41 }
  0xa5   :  { %v69_v59 = vmul.f32 0.00390625, %v47_v43 }
  0xa6   :  { %v143_v10 = vrot.slane %v73_v56, %v117_v55 }
  0xa7   :  { %v62_v45 = vpop.xlane.xlu1 %61  ;;  %v118_v22 = vrot.slane %v69_v59, %v117_v55 }
  0xa8   :  { %v50_v48 = vpop.xlane.xlu0 %49  ;;  %v74_v50 = vmul.f32 0.00390625, %v62_v45 }
  0xa9   :  { %v70_v52 = vmul.f32 0.00390625, %v50_v48 }
  0xaa   :  { %v147_v61 = vrot.slane %v74_v50, %v122_v49 }
  0xab   :  { %v65_v54 = vpop.xlane.xlu1 %64  ;;  %v123_v63 = vrot.slane %v70_v52, %v122_v49 }
  0xac   :  { %v75_v57 = vmul.f32 0.00390625, %v65_v54  ;;  %v53_v58 = vpop.xlane.xlu0 %52  ;;  %v148_v24 = vsel %vm124_vm1, %v147_v61, %v143_v10 }
  0xad   :  { %v71_v60 = vmul.f32 0.00390625, %v53_v58  ;;  %v125_v26 = vsel %vm124_vm1, %v123_v63, %v118_v22  ;;  %v443_v22 = vsub.s32 0, %v763_v47 }
  0xae   :  { %v152_v3 = vrot.slane %v75_v57, %v129_v53 }
  0xaf   :  { %v68_v7 = vpop.xlane.xlu1 %67  ;;  %v130_v11 = vrot.slane %v71_v60, %v129_v53 }
  0xb0   :  { %v76_v16 = vmul.f32 0.00390625, %v68_v7  ;;  %v56_v17 = vpop.xlane.xlu0 %55  ;;  %v153_v27 = vsel %vm131_vm2, %v152_v3, %v148_v24 }
  0xb1   :  { %v72_v23 = vmul.f32 0.00390625, %v56_v17  ;;  %v132_v30 = vsel %vm131_vm2, %v130_v11, %v125_v26 }
  0xb2   :  { %v157_v25 = vrot.slane %v76_v16, %v136_v62 }
  0xb3   :  { %v137_v28 = vrot.slane %v72_v23, %v136_v62  ;;  %v82_v29 = vpop.xlane.xlu1 %81 }
  0xb4   :  { %v79_v31 = vpop.xlane.xlu0 %78  ;;  %v158_v32 = vsel %vm138_vm3, %v157_v25, %v153_v27  ;;  %v250_v42 = vrot.slane %v82_v29, %v122_v49  ;;  %v462_v25 = vsub.s32 1, %v763_v47 }
  0xb5   :  { %v139_v33 = vsel %vm138_vm3, %v137_v28, %v132_v30  ;;  %v246_v43 = vrot.slane %v79_v31, %v117_v55 }
  0xb6   :  { %v160_v34 = vsel %vm159_vm4, %v158_v32, %v139_v33 }
  0xb7   :  { %554 = vmatmul.mubr.msk.f32.vlgmr.msra.gmra.mrb[0].mxu0 %vm161_vm5, %v160_v34  ;;  %v94_v35 = vpop.xlane.xlu1 %93  ;;  %v251_v52 = vsel %vm124_vm1, %v250_v42, %v246_v43 }
  0xb8   :  { %v91_v36 = vpop.xlane.xlu0 %90  ;;  %569 = vmatprep.mubr.msk.f32.mxu0 %vm647_vm0, %v648_v39  ;;  %v269_v38 = vrot.slane %v94_v35, %v122_v49 }
  0xb9   :  { %v265_v40 = vrot.slane %v91_v36, %v117_v55 }
  0xbb   :  { %v97_v37 = vpop.xlane.xlu1 %96  ;;  %v270_v48 = vsel %vm124_vm1, %v269_v38, %v265_v40 }
  0xbc   :  { %v85_v41 = vpop.xlane.xlu0 %84  ;;  %v274_v44 = vrot.slane %v97_v37, %v129_v53 }
  0xbd   :  { %v255_v45 = vrot.slane %v85_v41, %v129_v53  ;;  %v356_v53 = vld [vmem:[%s824_s2] sm:$0x3]  ;;  %s649_s2 = smov [#allocation5]  }
  0xbe   :  { %v275_v54 = vsel %vm131_vm2, %v274_v44, %v270_v48  ;;  %568 = vmatpush3.msk.msra.mxu0 %vm361_vm6, %v356_v53  ;;  %s516_s7 = sshll.u32 %s649_s2, 4  ;;  %s517_s7 = int_to_ptr.vmem [resolvable:$true] %s516_s7 }
  0xbf   :  { %v100_v46 = vpop.xlane.xlu1 %99  ;;  %v256_v39 = vsel %vm131_vm2, %v255_v45, %v251_v52  ;;  %s617_s8 = scalar_lea.vmem %s517_s7, 2048  ;;  %p622_p9 = scmp.lt.s32.totalorder %s517_s7, %s517_s7 }
  0xc0   :  { %v279_v50 = vrot.slane %v100_v46, %v136_v62  ;;  %v88_v51 = vpop.xlane.xlu0 %87  ;;  %p618_p8 = scmp.ne.s32.totalorder %s517_s7, %s617_s8  ;;  %p623_p10 = scmp.lt.s32.totalorder %s617_s8, %s617_s8 }
  0xc1   :  { %v260_v56 = vrot.slane %v88_v51, %v136_v62 }
  0xc2   :  { %v280_v57 = vsel %vm138_vm3, %v279_v50, %v275_v54  ;;  %p624_p11 = por %p623_p10, %p622_p9 }
  0xc3   :  { %v261_v58 = vsel %vm138_vm3, %v260_v56, %v256_v39 }
  0xc4   :  { %v281_v49 = vsel %vm159_vm4, %v280_v57, %v261_v58  ;;  %p625_p12 = pnand %p624_p11, %p618_p8 }
  0xc5   :  { %565 = vmatmul.mubr.msk.f32.vlgmr.msra.gmra.mrb[0].mxu1 %vm161_vm5, %v281_v49 }
 0x18a   :  { %v230_v55 = vpop.f32.mrb[0].mxu0 }
 0x18b   :  { %v555_v59 = vpop.f32.mrb[1].mxu0  ;;  %v234_v61 = vmax.f32 %v230_v55, 0.0 }
 0x198   :  { %v350_v60 = vpop.f32.mrb[0].mxu1 }
 0x199   :  { %v354_v62 = vmax.f32 %v350_v60, 0.0  ;;  %v566_v63 = vpop.f32.mrb[1].mxu1 }
 0x19b   :  { %v355_v3 = vadd.f32 %v354_v62, %v234_v61 }
 0x19d   :  { %570 = vmatmul.mubr.msk.f32.vlgmr.msra.gmra.mrb[2].mxu0 %vm357_vm7, %v355_v3 }
 0x270   :  { %v431_v7 = vpop.f32.mrb[2].mxu0 }
 0x271   :  { %v532_v10 = vmul.f32 -1.442695, %v431_v7  ;;  %v571_v11 = vpop.f32.mrb[3].mxu0 }
 0x273   :  { %591 = vpow2.f32 %v532_v10 }
 0x27d   :  { %v592_v16 = vpop.eup %591 }
 0x27e   :  { %v438_v17 = vadd.f32 1.0, %v592_v16 }
 0x280   :  { %593 = vrcp.f32 %v438_v17 }
 0x28a   :  { %v594_v23 = vpop.eup %593 }
 0x28b   :  { %v444_v24 = vrot.slane %v594_v23, %v443_v22  ;;  %v463_v26 = vrot.slane %v594_v23, %v462_v25 }
 0x28d   :  { %450 = vbcast.lane.b32.xlu1 %v444_v24, 264  ;;  %446 = vbcast.lane.b32.xlu0 %v444_v24, 256 }
 0x291   :  { %454 = vbcast.lane.b32.xlu1 %v444_v24, 272  ;;  %465 = vbcast.lane.b32.xlu0 %v463_v26, 256 }
 0x295   :  { %458 = vbcast.lane.b32.xlu1 %v444_v24, 280  ;;  %473 = vbcast.lane.b32.xlu0 %v463_v26, 272 }
 0x299   :  { %469 = vbcast.lane.b32.xlu1 %v463_v26, 264 }
 0x29d   :  { %477 = vbcast.lane.b32.xlu1 %v463_v26, 280 }
 0x2ff   :  { %v451_v27 = vpop.permute.xlu1 %450  ;;  %v447_v28 = vpop.permute.xlu0 %446 }
 0x300   :  { %v481_v29 = vmul.f32 %v451_v27, %v701_v8  ;;  %v482_v30 = vmul.f32 %v451_v27, %v703_v9  ;;  %v479_v31 = vmul.f32 %v447_v28, %v689_v2  ;;  %v480_v32 = vmul.f32 %v447_v28, %v693_v4 }
 0x302   :  { %497 = vst [vmem:[#allocation5 + $0x10] sm:$0xff] %v481_v29  ;;  %498 = vst [vmem:[#allocation5 + $0x18] sm:$0xff] %v482_v30 }
 0x303   :  { %495 = vst [vmem:[#allocation5] sm:$0xff] %v479_v31  ;;  %496 = vst [vmem:[#allocation5 + $0x8] sm:$0xff] %v480_v32  ;;  %v455_v47 = vpop.permute.xlu1 %454  ;;  %v466_v33 = vpop.permute.xlu0 %465 }
 0x304   :  { %v483_v34 = vmul.f32 %v455_v47, %v713_v14  ;;  %v484_v35 = vmul.f32 %v455_v47, %v715_v15  ;;  %v487_v36 = vmul.f32 %v466_v33, %v685_v0  ;;  %v488_v8 = vmul.f32 %v466_v33, %v687_v1 }
 0x306   :  { %499 = vst [vmem:[#allocation5 + $0x20] sm:$0xff] %v483_v34  ;;  %500 = vst [vmem:[#allocation5 + $0x28] sm:$0xff] %v484_v35 }
 0x307   :  { %503 = vst [vmem:[#allocation5 + $0x40] sm:$0xff] %v487_v36  ;;  %504 = vst [vmem:[#allocation5 + $0x48] sm:$0xff] %v488_v8  ;;  %v459_v2 = vpop.permute.xlu1 %458  ;;  %v474_v4 = vpop.permute.xlu0 %473 }
 0x308   :  { %v485_v9 = vmul.f32 %v459_v2, %v725_v20  ;;  %v486_v37 = vmul.f32 %v459_v2, %v727_v21  ;;  %v491_v38 = vmul.f32 %v474_v4, %v709_v12  ;;  %v492_v14 = vmul.f32 %v474_v4, %v711_v13 }
 0x30a   :  { %501 = vst [vmem:[#allocation5 + $0x30] sm:$0xff] %v485_v9  ;;  %502 = vst [vmem:[#allocation5 + $0x38] sm:$0xff] %v486_v37 }
 0x30b   :  { %507 = vst [vmem:[#allocation5 + $0x60] sm:$0xff] %v491_v38  ;;  %508 = vst [vmem:[#allocation5 + $0x68] sm:$0xff] %v492_v14  ;;  %v470_v0 = vpop.permute.xlu1 %469 }
 0x30c   :  { %v489_v1 = vmul.f32 %v470_v0, %v695_v5  ;;  %v490_v15 = vmul.f32 %v470_v0, %v697_v6 }
 0x30e   :  { %505 = vst [vmem:[#allocation5 + $0x50] sm:$0xff] %v489_v1  ;;  %506 = vst [vmem:[#allocation5 + $0x58] sm:$0xff] %v490_v15 }
 0x30f   :  { %v478_v20 = vpop.permute.xlu1 %477 }
 0x310   :  { %v493_v21 = vmul.f32 %v478_v20, %v721_v18  ;;  %v494_v12 = vmul.f32 %v478_v20, %v723_v19 }
 0x312   :  { %509 = vst [vmem:[#allocation5 + $0x70] sm:$0xff] %v493_v21  ;;  %510 = vst [vmem:[#allocation5 + $0x78] sm:$0xff] %v494_v12 }
 0x313   :  { %628 = shalt.err (!%p625_p12)
}
 0x314   :  { %s629_s11 = scalar_lea.hbm %s825_s3, 2048 }
 0x315   :  { %p630_p13 = scmp.ne.s32.totalorder %s825_s3, %s629_s11  ;;  %p633_p0 = scmp.lt.u32.totalorder %s629_s11, %s825_s3 }
 0x317   :  { %p635_p1 = pnand %p633_p0, %p630_p13 }
 0x319   :  { %638 = shalt.err (!%p635_p1)
}
 0x31a   :  { %522 = dma.vmem_to_hbm [thread:$0]  %s517_s7, 2048, %s825_s3, [#allocation4], %s644_s22, %s644_s22, %s645_s23  }
 0x31b   :  { %641 = dma.done.wait [#allocation4], 2048  }
 0x31c   :  { %642 = vsyncadd [#allocation4], 4294965248 }
 0x31d   :  { %526 = vsyncpa [#allocation3], 1 }
 0x31e   :  { %527 = vsyncpa [#allocation4], 1 }

</bundles_post_ra>
